<compile_context>
chip_gen: v7x
topology: tpu7x:2x2x1
jax: 0.10.0
libtpu: 0.0.40
codegen_flags: <defaults>
</compile_context>

<pallas_src>
import jax
import jax.numpy as jnp
from jax.experimental import pallas as pl
from jax.experimental.pallas import tpu as pltpu


# ----------------------------------------------------------------------------
# Kernel: one batch tile, all heads (heads lane-packed, layer 2/3 chunked).
# ----------------------------------------------------------------------------
def _reward_kernel(x_ref, w1_ref, b1_ref, w2_ref, b2_ref, w3_ref, b3_ref,
                   out_ref):
    """x_ref:  (tb, in)            bf16 batch tile
    w1_ref: (in, MH)              bf16, heads packed along lanes
    b1_ref: (1, MH)               f32
    w2_ref: (n_chunks, C, C)      bf16 block-diagonal chunks
    b2_ref: (1, MH)               f32
    w3_ref: (n_chunks, C, 128)    bf16, head m's column at global index m
    b3_ref: (1, 128)              f32
    out_ref:(tb, 128)             f32 lane-dense per-head outputs
    """
    n_chunks, chunk, _ = w2_ref.shape
    tb = x_ref.shape[0]

    # Layer 1 (all heads at once): bf16 matmul, f32 accumulate + bias + ReLU.
    h1 = jnp.maximum(
        jnp.dot(x_ref[...], w1_ref[...], preferred_element_type=jnp.float32)
        + b1_ref[...],
        0.0)                                              # (tb, MH) f32
    h1 = h1.astype(w2_ref.dtype)                          # bf16 for next dot

    # Layers 2 + 3, chunk-by-chunk over the nonzero diagonal blocks.
    # n_chunks is 3 (C=256) or 5 (C=128) -> statically unrolled.
    acc = jnp.zeros((tb, out_ref.shape[1]), jnp.float32)
    for c in range(n_chunks):
        lo, hi = c * chunk, (c + 1) * chunk
        h1_c = h1[:, lo:hi]                               # (tb, C) bf16
        h2_c = jnp.maximum(
            jnp.dot(h1_c, w2_ref[c], preferred_element_type=jnp.float32)
            + b2_ref[:, lo:hi],
            0.0)                                          # (tb, C) f32
        acc = acc + jnp.dot(h2_c.astype(w3_ref.dtype), w3_ref[c],
                            preferred_element_type=jnp.float32)
    out_ref[...] = acc + b3_ref[...]


# ----------------------------------------------------------------------------
# One-time parameter packing (hoisted out of the per-call forward).
# ----------------------------------------------------------------------------
def _default_chunk_width():
    """256-wide chunks match the v6e/v7x 256x256 MXU; 128 matches v5e."""
    try:
        kind = jax.devices()[0].device_kind.lower()
    except Exception:  # pragma: no cover
        kind = ""
    if "v5 lite" in kind or "v5lite" in kind or "v5e" in kind:
        return 128
    return 256


def pack_option_reward_net_params(params, *, chunk_width=None,
                                  matmul_dtype=jnp.bfloat16, out_pad=128):
    """Pack the per-head MLP weights for the kernel. Call once and cache."""
    w1, b1, w2, b2, w3, b3 = params
    M, in_size, H = w1.shape
    C = _default_chunk_width() if chunk_width is None else chunk_width
    assert C % H == 0 and C % 128 == 0
    hpc = C // H                      # heads per chunk
    n_chunks = -(-M // hpc)
    Mp = n_chunks * hpc               # heads padded to a whole number of chunks
    MH = Mp * H
    f32 = jnp.float32

    def pad_heads(a):
        return jnp.pad(a.astype(f32), [(0, Mp - M)] + [(0, 0)] * (a.ndim - 1))

    w1p, b1p, w2p, b2p, w3p = map(pad_heads, (w1, b1, w2, b2, w3))

    # Layer 1: columns m*H + h  ->  (in, MH).
    w1_packed = jnp.transpose(w1p, (1, 0, 2)).reshape(in_size, MH)
    w1_packed = w1_packed.astype(matmul_dtype)
    b1_row = b1p.reshape(1, MH)

    # Layer 2: per-chunk block-diagonal (n_chunks, C, C).
    eye = jnp.eye(hpc, dtype=f32)
    w2_chunks = jnp.einsum('cmij,mn->cminj',
                           w2p.reshape(n_chunks, hpc, H, H), eye)
    w2_chunks = w2_chunks.reshape(n_chunks, C, C).astype(matmul_dtype)
    b2_row = b2p.reshape(1, MH)

    # Layer 3: per-chunk (C, out_pad); head m's single output column sits at
    # global lane index m (dummy heads have zero weights, so zero contribution).
    col = jnp.arange(Mp).reshape(n_chunks, hpc)
    onehot = jax.nn.one_hot(col, out_pad, dtype=f32)            # (c, m, out_pad)
    w3_chunks = jnp.einsum('cmh,cmo->cmho',
                           w3p[:, :, 0].reshape(n_chunks, hpc, H), onehot)
    w3_chunks = w3_chunks.reshape(n_chunks, C, out_pad).astype(matmul_dtype)
    b3_row = jnp.zeros((1, out_pad), f32).at[0, :M].set(
        b3.reshape(M).astype(f32))

    return (w1_packed, b1_row, w2_chunks, b2_row, w3_chunks, b3_row)


# ----------------------------------------------------------------------------
# Forward (default flags: state + action only; option/next_option select head).
# ----------------------------------------------------------------------------
def option_base_reward_net_forward(state, action, next_state, done, option,
                                   next_option, packed_params, latent_dim):
    del next_state, done  # use_next_state=False, use_done=False
    w1_p, b1_row, w2_c, b2_row, w3_c, b3_row = packed_params
    B = state.shape[0]
    M = (latent_dim + 1) * latent_dim
    in_size, MH = w1_p.shape
    n_chunks, C, out_pad = w3_c.shape
    mm_dtype = w1_p.dtype

    # Flatten + concat the enabled inputs; cast once to the matmul dtype.
    x = jnp.concatenate([state.reshape(B, -1), action.reshape(B, -1)],
                        axis=1).astype(mm_dtype)
    assert x.shape[1] == in_size

    # Batch tiling: sublane multiples of 8, tiles up to 512 rows, and at least
    # 2 grid steps when B allows it (so "parallel" shards across v7x's 2 TCs).
    TB_MAX = 512
    b8 = ((B + 7) // 8) * 8
    if b8 <= 16:
        tb = b8
    else:
        tb = min(TB_MAX, ((pl.cdiv(B, 2) + 7) // 8) * 8)
    B_pad = pl.cdiv(B, tb) * tb
    if B_pad != B:
        x = jnp.pad(x, ((0, B_pad - B), (0, 0)))
    grid = (B_pad // tb,)

    out = pl.pallas_call(
        _reward_kernel,
        out_shape=jax.ShapeDtypeStruct((B_pad, out_pad), jnp.float32),
        grid_spec=pltpu.PrefetchScalarGridSpec(
            num_scalar_prefetch=0,
            grid=grid,
            in_specs=[
                pl.BlockSpec((tb, in_size), lambda i: (i, 0)),        # x
                pl.BlockSpec((in_size, MH), lambda i: (0, 0)),        # W1
                pl.BlockSpec((1, MH), lambda i: (0, 0)),              # b1
                pl.BlockSpec((n_chunks, C, C), lambda i: (0, 0, 0)),  # W2 chunks
                pl.BlockSpec((1, MH), lambda i: (0, 0)),              # b2
                pl.BlockSpec((n_chunks, C, out_pad),
                             lambda i: (0, 0, 0)),                    # W3 chunks
                pl.BlockSpec((1, out_pad), lambda i: (0, 0)),         # b3
            ],
            out_specs=pl.BlockSpec((tb, out_pad), lambda i: (i, 0)),
        ),
        compiler_params=pltpu.CompilerParams(
            dimension_semantics=("parallel",)),
    )(x, w1_p, b1_row, w2_c, b2_row, w3_c, b3_row)

    # Per-row head gather: head = option*latent_dim + next_option.
    # NOTE: option/next_option arrive as float (as in the reference module);
    # fractional/negative values would silently change the selected head.
    tgt = (option.astype(jnp.int32) * latent_dim
           + next_option.astype(jnp.int32)).reshape(B, 1)
    return jnp.take_along_axis(out[:B, :M], tgt, axis=1)[:, 0]   # (B,)


# ----------------------------------------------------------------------------
# Pure-JAX reference + synthetic params for testing.
# ----------------------------------------------------------------------------
def _reference_forward(x, tgt, params):
    w1, b1, w2, b2, w3, b3 = params
    h1 = jax.nn.relu(jnp.einsum('bi,mih->bmh', x, w1) + b1[:, 0][None])
    h2 = jax.nn.relu(jnp.einsum('bmh,mhk->bmk', h1, w2) + b2[:, 0][None])
    y = (jnp.einsum('bmh,mho->bmo', h2, w3) + b3[:, 0][None])[..., 0]  # (B, M)
    return jnp.take_along_axis(y, tgt, axis=1)[:, 0]


def _init_params(key, M, in_size, H):
    ks = jax.random.split(key, 6)
    s1, sH = 1.0 / jnp.sqrt(in_size), 1.0 / jnp.sqrt(H)
    w1 = jax.random.uniform(ks[0], (M, in_size, H), jnp.float32, -s1, s1)
    b1 = jax.random.uniform(ks[1], (M, 1, H), jnp.float32, -s1, s1)
    w2 = jax.random.uniform(ks[2], (M, H, H), jnp.float32, -sH, sH)
    b2 = jax.random.uniform(ks[3], (M, 1, H), jnp.float32, -sH, sH)
    w3 = jax.random.uniform(ks[4], (M, H, 1), jnp.float32, -sH, sH)
    b3 = jax.random.uniform(ks[5], (M, 1, 1), jnp.float32, -sH, sH)
    return (w1, b1, w2, b2, w3, b3)


if __name__ == "__main__":
    key = jax.random.PRNGKey(0)
    k_params = jax.random.fold_in(key, 123)

    obs_dim, act_dim, latent_dim, H = 12, 4, 4, 32
    M = (latent_dim + 1) * latent_dim
    in_size = obs_dim + act_dim

    params = _init_params(k_params, M, in_size, H)
    packed = pack_option_reward_net_params(params)      # one-time packing
    packed = jax.block_until_ready(packed)

    fwd = jax.jit(option_base_reward_net_forward,
                  static_argnames=("latent_dim",))

    for B in (8, 40):    # single-tile and multi-tile (padded) grids
        ks = jax.random.split(jax.random.fold_in(key, B), 4)
        state = jax.random.normal(ks[0], (B, obs_dim), jnp.float32)
        action = jax.random.normal(ks[1], (B, act_dim), jnp.float32)
        next_state = jnp.zeros_like(state)               # unused
        done = jnp.zeros((B,), jnp.float32)              # unused
        option = jax.random.randint(
            ks[2], (B,), 0, latent_dim).astype(jnp.float32)
        next_option = jax.random.randint(
            ks[3], (B,), 0, latent_dim).astype(jnp.float32)

        reward = fwd(state, action, next_state, done, option, next_option,
                     packed, latent_dim=latent_dim)
        reward = jax.block_until_ready(reward)
        assert reward.shape == (B,)

        # Correctness vs. f32 reference (bf16 matmuls -> loosened tolerance).
        x = jnp.concatenate([state, action], axis=1)
        tgt = (option.astype(jnp.int32) * latent_dim
               + next_option.astype(jnp.int32)).reshape(B, 1)
        ref = _reference_forward(x, tgt, params)
        assert jnp.allclose(reward, ref, atol=3e-2, rtol=3e-2), (B, reward, ref)

    print("KERNEL_OK")
</pallas_src>

<mosaic_0001>
module attributes {stable_mosaic.version = 11 : i64} {
  func.func @_reward_kernel(%arg0: i32, %arg1: memref<8x16xbf16, #tpu.memory_space<vmem>>, %arg2: memref<16x768xbf16, #tpu.memory_space<vmem>>, %arg3: memref<1x768xf32, #tpu.memory_space<vmem>>, %arg4: memref<3x256x256xbf16, #tpu.memory_space<vmem>>, %arg5: memref<1x768xf32, #tpu.memory_space<vmem>>, %arg6: memref<3x256x128xbf16, #tpu.memory_space<vmem>>, %arg7: memref<1x128xf32, #tpu.memory_space<vmem>>, %arg8: memref<8x128xf32, #tpu.memory_space<vmem>>) attributes {dimension_semantics = [#tpu.dimension_semantics<parallel>], iteration_bounds = array<i64: 1>, scalar_prefetch = 0 : i64, scratch_operands = 0 : i64, tpu.core_type = #tpu.core_type<tc>, window_params = [{transform_indices = @transform_0, window_bounds = array<i64: 8, 16>}, {pipeline_mode = #tpu.pipeline_mode<synchronous>, transform_indices = @transform_1, window_bounds = array<i64: 16, 768>}, {pipeline_mode = #tpu.pipeline_mode<synchronous>, transform_indices = @transform_2, window_bounds = array<i64: 1, 768>}, {pipeline_mode = #tpu.pipeline_mode<synchronous>, transform_indices = @transform_3, window_bounds = array<i64: 3, 256, 256>}, {pipeline_mode = #tpu.pipeline_mode<synchronous>, transform_indices = @transform_4, window_bounds = array<i64: 1, 768>}, {pipeline_mode = #tpu.pipeline_mode<synchronous>, transform_indices = @transform_5, window_bounds = array<i64: 3, 256, 128>}, {pipeline_mode = #tpu.pipeline_mode<synchronous>, transform_indices = @transform_6, window_bounds = array<i64: 1, 128>}, {transform_indices = @transform_7, window_bounds = array<i64: 8, 128>}]} {
    %c0 = arith.constant 0 : index
    %c0_0 = arith.constant 0 : index
    %0 = vector.load %arg1[%c0, %c0_0] : memref<8x16xbf16, #tpu.memory_space<vmem>>, vector<8x16xbf16>
    %c0_1 = arith.constant 0 : index
    %c0_2 = arith.constant 0 : index
    %1 = vector.load %arg2[%c0_1, %c0_2] : memref<16x768xbf16, #tpu.memory_space<vmem>>, vector<16x768xbf16>
    %cst = arith.constant dense<0.000000e+00> : vector<8x768xf32>
    %2 = tpu.matmul %0, %1, %cst {dimension_numbers = #tpu.dot_dimension_numbers<[1], [0], [0], [1], [0, 0, 1, 1], [], []>} : vector<8x16xbf16>, vector<16x768xbf16>, vector<8x768xf32> -> vector<8x768xf32>
    %c0_3 = arith.constant 0 : index
    %c0_4 = arith.constant 0 : index
    %3 = vector.load %arg3[%c0_3, %c0_4] : memref<1x768xf32, #tpu.memory_space<vmem>>, vector<1x768xf32>
    %4 = vector.broadcast %3 : vector<1x768xf32> to vector<8x768xf32>
    %5 = arith.addf %2, %4 : vector<8x768xf32>
    %cst_5 = arith.constant 0.000000e+00 : f32
    %6 = vector.broadcast %cst_5 : f32 to vector<8x768xf32>
    %7 = arith.maximumf %5, %6 : vector<8x768xf32>
    %8 = arith.truncf %7 : vector<8x768xf32> to vector<8x768xbf16>
    %cst_6 = arith.constant 0.000000e+00 : f32
    %9 = vector.broadcast %cst_6 : f32 to vector<8x128xf32>
    %10 = vector.extract_strided_slice %8 {offsets = [0, 0], sizes = [8, 256], strides = [1, 1]} : vector<8x768xbf16> to vector<8x256xbf16>
    %c0_7 = arith.constant 0 : index
    %c0_8 = arith.constant 0 : index
    %c0_9 = arith.constant 0 : index
    %11 = vector.load %arg4[%c0_7, %c0_8, %c0_9] : memref<3x256x256xbf16, #tpu.memory_space<vmem>>, vector<1x256x256xbf16>
    %12 = vector.shape_cast %11 : vector<1x256x256xbf16> to vector<256x256xbf16>
    %cst_10 = arith.constant dense<0.000000e+00> : vector<8x256xf32>
    %13 = tpu.matmul %10, %12, %cst_10 {dimension_numbers = #tpu.dot_dimension_numbers<[1], [0], [0], [1], [0, 0, 1, 1], [], []>} : vector<8x256xbf16>, vector<256x256xbf16>, vector<8x256xf32> -> vector<8x256xf32>
    %c0_11 = arith.constant 0 : index
    %c0_12 = arith.constant 0 : index
    %14 = vector.load %arg5[%c0_11, %c0_12] : memref<1x768xf32, #tpu.memory_space<vmem>>, vector<1x256xf32>
    %15 = vector.broadcast %14 : vector<1x256xf32> to vector<8x256xf32>
    %16 = arith.addf %13, %15 : vector<8x256xf32>
    %cst_13 = arith.constant 0.000000e+00 : f32
    %17 = vector.broadcast %cst_13 : f32 to vector<8x256xf32>
    %18 = arith.maximumf %16, %17 : vector<8x256xf32>
    %19 = arith.truncf %18 : vector<8x256xf32> to vector<8x256xbf16>
    %c0_14 = arith.constant 0 : index
    %c0_15 = arith.constant 0 : index
    %c0_16 = arith.constant 0 : index
    %20 = vector.load %arg6[%c0_14, %c0_15, %c0_16] : memref<3x256x128xbf16, #tpu.memory_space<vmem>>, vector<1x256x128xbf16>
    %21 = vector.shape_cast %20 : vector<1x256x128xbf16> to vector<256x128xbf16>
    %cst_17 = arith.constant dense<0.000000e+00> : vector<8x128xf32>
    %22 = tpu.matmul %19, %21, %cst_17 {dimension_numbers = #tpu.dot_dimension_numbers<[1], [0], [0], [1], [0, 0, 1, 1], [], []>} : vector<8x256xbf16>, vector<256x128xbf16>, vector<8x128xf32> -> vector<8x128xf32>
    %23 = arith.addf %9, %22 : vector<8x128xf32>
    %24 = vector.extract_strided_slice %8 {offsets = [0, 256], sizes = [8, 256], strides = [1, 1]} : vector<8x768xbf16> to vector<8x256xbf16>
    %c1 = arith.constant 1 : index
    %c0_18 = arith.constant 0 : index
    %c0_19 = arith.constant 0 : index
    %25 = vector.load %arg4[%c1, %c0_18, %c0_19] : memref<3x256x256xbf16, #tpu.memory_space<vmem>>, vector<1x256x256xbf16>
    %26 = vector.shape_cast %25 : vector<1x256x256xbf16> to vector<256x256xbf16>
    %cst_20 = arith.constant dense<0.000000e+00> : vector<8x256xf32>
    %27 = tpu.matmul %24, %26, %cst_20 {dimension_numbers = #tpu.dot_dimension_numbers<[1], [0], [0], [1], [0, 0, 1, 1], [], []>} : vector<8x256xbf16>, vector<256x256xbf16>, vector<8x256xf32> -> vector<8x256xf32>
    %c0_21 = arith.constant 0 : index
    %c256 = arith.constant 256 : index
    %28 = vector.load %arg5[%c0_21, %c256] : memref<1x768xf32, #tpu.memory_space<vmem>>, vector<1x256xf32>
    %29 = vector.broadcast %28 : vector<1x256xf32> to vector<8x256xf32>
    %30 = arith.addf %27, %29 : vector<8x256xf32>
    %cst_22 = arith.constant 0.000000e+00 : f32
    %31 = vector.broadcast %cst_22 : f32 to vector<8x256xf32>
    %32 = arith.maximumf %30, %31 : vector<8x256xf32>
    %33 = arith.truncf %32 : vector<8x256xf32> to vector<8x256xbf16>
    %c1_23 = arith.constant 1 : index
    %c0_24 = arith.constant 0 : index
    %c0_25 = arith.constant 0 : index
    %34 = vector.load %arg6[%c1_23, %c0_24, %c0_25] : memref<3x256x128xbf16, #tpu.memory_space<vmem>>, vector<1x256x128xbf16>
    %35 = vector.shape_cast %34 : vector<1x256x128xbf16> to vector<256x128xbf16>
    %cst_26 = arith.constant dense<0.000000e+00> : vector<8x128xf32>
    %36 = tpu.matmul %33, %35, %cst_26 {dimension_numbers = #tpu.dot_dimension_numbers<[1], [0], [0], [1], [0, 0, 1, 1], [], []>} : vector<8x256xbf16>, vector<256x128xbf16>, vector<8x128xf32> -> vector<8x128xf32>
    %37 = arith.addf %23, %36 : vector<8x128xf32>
    %38 = vector.extract_strided_slice %8 {offsets = [0, 512], sizes = [8, 256], strides = [1, 1]} : vector<8x768xbf16> to vector<8x256xbf16>
    %c2 = arith.constant 2 : index
    %c0_27 = arith.constant 0 : index
    %c0_28 = arith.constant 0 : index
    %39 = vector.load %arg4[%c2, %c0_27, %c0_28] : memref<3x256x256xbf16, #tpu.memory_space<vmem>>, vector<1x256x256xbf16>
    %40 = vector.shape_cast %39 : vector<1x256x256xbf16> to vector<256x256xbf16>
    %cst_29 = arith.constant dense<0.000000e+00> : vector<8x256xf32>
    %41 = tpu.matmul %38, %40, %cst_29 {dimension_numbers = #tpu.dot_dimension_numbers<[1], [0], [0], [1], [0, 0, 1, 1], [], []>} : vector<8x256xbf16>, vector<256x256xbf16>, vector<8x256xf32> -> vector<8x256xf32>
    %c0_30 = arith.constant 0 : index
    %c512 = arith.constant 512 : index
    %42 = vector.load %arg5[%c0_30, %c512] : memref<1x768xf32, #tpu.memory_space<vmem>>, vector<1x256xf32>
    %43 = vector.broadcast %42 : vector<1x256xf32> to vector<8x256xf32>
    %44 = arith.addf %41, %43 : vector<8x256xf32>
    %cst_31 = arith.constant 0.000000e+00 : f32
    %45 = vector.broadcast %cst_31 : f32 to vector<8x256xf32>
    %46 = arith.maximumf %44, %45 : vector<8x256xf32>
    %47 = arith.truncf %46 : vector<8x256xf32> to vector<8x256xbf16>
    %c2_32 = arith.constant 2 : index
    %c0_33 = arith.constant 0 : index
    %c0_34 = arith.constant 0 : index
    %48 = vector.load %arg6[%c2_32, %c0_33, %c0_34] : memref<3x256x128xbf16, #tpu.memory_space<vmem>>, vector<1x256x128xbf16>
    %49 = vector.shape_cast %48 : vector<1x256x128xbf16> to vector<256x128xbf16>
    %cst_35 = arith.constant dense<0.000000e+00> : vector<8x128xf32>
    %50 = tpu.matmul %47, %49, %cst_35 {dimension_numbers = #tpu.dot_dimension_numbers<[1], [0], [0], [1], [0, 0, 1, 1], [], []>} : vector<8x256xbf16>, vector<256x128xbf16>, vector<8x128xf32> -> vector<8x128xf32>
    %51 = arith.addf %37, %50 : vector<8x128xf32>
    %c0_36 = arith.constant 0 : index
    %c0_37 = arith.constant 0 : index
    %52 = vector.load %arg7[%c0_36, %c0_37] : memref<1x128xf32, #tpu.memory_space<vmem>>, vector<1x128xf32>
    %53 = vector.broadcast %52 : vector<1x128xf32> to vector<8x128xf32>
    %54 = arith.addf %51, %53 : vector<8x128xf32>
    %c0_38 = arith.constant 0 : index
    %c0_39 = arith.constant 0 : index
    %55 = vector.load %arg8[%c0_38, %c0_39] : memref<8x128xf32, #tpu.memory_space<vmem>>, vector<8x128xf32>
    tpu.vector_store %arg8[%c0_38, %c0_39], %54 {strides = array<i32>} : memref<8x128xf32, #tpu.memory_space<vmem>>, vector<8x128xf32>,
    return
  }
  func.func @transform_0(%arg0: i32) -> (i32, i32) {
    %c0_i32 = arith.constant 0 : i32
    %c0_i32_0 = arith.constant 0 : i32
    return %arg0, %c0_i32 : i32, i32
  }
  func.func @transform_1(%arg0: i32) -> (i32, i32) {
    %c0_i32 = arith.constant 0 : i32
    %c0_i32_0 = arith.constant 0 : i32
    %c0_i32_1 = arith.constant 0 : i32
    return %c0_i32, %c0_i32_0 : i32, i32
  }
  func.func @transform_2(%arg0: i32) -> (i32, i32) {
    %c0_i32 = arith.constant 0 : i32
    %c0_i32_0 = arith.constant 0 : i32
    %c0_i32_1 = arith.constant 0 : i32
    return %c0_i32, %c0_i32_0 : i32, i32
  }
  func.func @transform_3(%arg0: i32) -> (i32, i32, i32) {
    %c0_i32 = arith.constant 0 : i32
    %c0_i32_0 = arith.constant 0 : i32
    %c0_i32_1 = arith.constant 0 : i32
    %c0_i32_2 = arith.constant 0 : i32
    return %c0_i32, %c0_i32_0, %c0_i32_1 : i32, i32, i32
  }
  func.func @transform_4(%arg0: i32) -> (i32, i32) {
    %c0_i32 = arith.constant 0 : i32
    %c0_i32_0 = arith.constant 0 : i32
    %c0_i32_1 = arith.constant 0 : i32
    return %c0_i32, %c0_i32_0 : i32, i32
  }
  func.func @transform_5(%arg0: i32) -> (i32, i32, i32) {
    %c0_i32 = arith.constant 0 : i32
    %c0_i32_0 = arith.constant 0 : i32
    %c0_i32_1 = arith.constant 0 : i32
    %c0_i32_2 = arith.constant 0 : i32
    return %c0_i32, %c0_i32_0, %c0_i32_1 : i32, i32, i32
  }
  func.func @transform_6(%arg0: i32) -> (i32, i32) {
    %c0_i32 = arith.constant 0 : i32
    %c0_i32_0 = arith.constant 0 : i32
    %c0_i32_1 = arith.constant 0 : i32
    return %c0_i32, %c0_i32_0 : i32, i32
  }
  func.func @transform_7(%arg0: i32) -> (i32, i32) {
    %c0_i32 = arith.constant 0 : i32
    %c0_i32_0 = arith.constant 0 : i32
    return %arg0, %c0_i32 : i32, i32
  }
}

</mosaic_0001>

<bundles_post_ra>
// kernel: option_base_reward_net_forward.1
= control target key start
LH: loop header
LB: loop body
LE: loop exit
PB: predicated region body
PF: predicated region fallthrough
CT: control target
= control target key end

     0   :  { %12 = vsyncpa [#allocation3], 0  ;;  %s2250_s0 = inlined_call_operand.vmem [shape: bf16[8,16], index: 0, kind: input, shape index: {}]   ;;  %s2251_s1 = inlined_call_operand.vmem [shape: bf16[16,768], index: 1, kind: input, shape index: {}]   ;;  %s2252_s2 = inlined_call_operand.vmem [shape: f32[1,768], index: 2, kind: input, shape index: {}]   ;;  %s2253_s3 = inlined_call_operand.hbm [shape: bf16[3,256,256], index: 3, kind: input, shape index: {}]   ;;  %s2254_s4 = inlined_call_operand.hbm [shape: f32[1,768], index: 4, kind: input, shape index: {}]   ;;  %s2255_s5 = inlined_call_operand.hbm [shape: bf16[3,256,128], index: 5, kind: input, shape index: {}]   ;;  %s2256_s6 = inlined_call_operand.hbm [shape: f32[1,128], index: 6, kind: input, shape index: {}]   ;;  %s2257_s7 = inlined_call_operand.vmem [shape: f32[8,128], index: 7, kind: output, shape index: {}]  }
   0x1   :  { %13 = vsyncpa [#allocation5], 0 }
   0x2   :  { %14 = vsyncpa [#allocation8], 0  ;;  %s2082_s24 = smov [#allocation4]   ;;  %s2083_s26 = smov [#allocation2]  }
   0x3   :  { %s39_s25 = sshll.u32 %s2082_s24, 4  ;;  %s26_s27 = sshll.u32 %s2083_s26, 4  ;;  %s40_s25 = int_to_ptr.vmem [resolvable:$true] %s39_s25  ;;  %s2131_s27 = int_to_ptr.vmem [resolvable:$true] %s26_s27 }
   0x4   :  { %s1988_s30 = scalar_lea.hbm %s2254_s4, 96 }
   0x5   :  { %p1989_p0 = scmp.ne.s32.totalorder %s2254_s4, %s1988_s30  ;;  %p1992_p1 = scmp.lt.u32.totalorder %s1988_s30, %s2254_s4 }
   0x7   :  { %p1994_p2 = pnand %p1992_p1, %p1989_p0 }
   0x9   :  { %1997 = shalt.err (!%p1994_p2)
}
   0xa   :  { %s1998_s12 = scalar_lea.vmem %s40_s25, 96  ;;  %p2003_p4 = scmp.lt.s32.totalorder %s40_s25, %s40_s25 }
   0xb   :  { %p1999_p3 = scmp.ne.s32.totalorder %s40_s25, %s1998_s12  ;;  %p2004_p5 = scmp.lt.s32.totalorder %s1998_s12, %s1998_s12 }
   0xd   :  { %p2005_p6 = por %p2004_p5, %p2003_p4 }
   0xf   :  { %p2006_p7 = pnand %p2005_p6, %p1999_p3 }
  0x11   :  { %2009 = shalt.err (!%p2006_p7)
}
  0x12   :  { %42 = dma.hbm_to_vmem [thread:$0]  %s2254_s4, 96, %s40_s25, [#allocation5]  }
  0x13   :  { %s2010_s17 = scalar_lea.hbm %s2253_s3, 12288 }
  0x14   :  { %p2011_p8 = scmp.ne.s32.totalorder %s2253_s3, %s2010_s17  ;;  %p2014_p9 = scmp.lt.u32.totalorder %s2010_s17, %s2253_s3 }
  0x16   :  { %p2016_p10 = pnand %p2014_p9, %p2011_p8 }
  0x18   :  { %2019 = shalt.err (!%p2016_p10)
}
  0x19   :  { %s2020_s22 = scalar_lea.vmem %s2131_s27, 12288  ;;  %p2025_p12 = scmp.lt.s32.totalorder %s2131_s27, %s2131_s27 }
  0x1a   :  { %p2021_p11 = scmp.ne.s32.totalorder %s2131_s27, %s2020_s22  ;;  %p2026_p13 = scmp.lt.s32.totalorder %s2020_s22, %s2020_s22 }
  0x1c   :  { %p2027_p0 = por %p2026_p13, %p2025_p12 }
  0x1e   :  { %p2028_p1 = pnand %p2027_p0, %p2021_p11 }
  0x20   :  { %2031 = shalt.err (!%p2028_p1)
}
  0x21   :  { %s2084_s4 = smov 128   ;;  %s2085_s23 = smov 8  }
  0x22   :  { %32 = dma.hbm_to_vmem [thread:$0]  %s2253_s3, 12288, %s2131_s27, [#allocation3], %s2084_s4, %s2084_s4, %s2085_s23  }
  0x23   :  { %s2086_s26 = smov [#allocation6]   ;;  %s2032_s8 = scalar_lea.hbm %s2255_s5, 6144 }
  0x24   :  { %s48_s28 = sshll.u32 %s2086_s26, 4  ;;  %p2033_p2 = scmp.ne.s32.totalorder %s2255_s5, %s2032_s8  ;;  %s49_s28 = int_to_ptr.vmem [resolvable:$true] %s48_s28 }
  0x25   :  { %p2036_p3 = scmp.lt.u32.totalorder %s2032_s8, %s2255_s5 }
  0x27   :  { %p2038_p4 = pnand %p2036_p3, %p2033_p2 }
  0x29   :  { %2041 = shalt.err (!%p2038_p4)
}
  0x2a   :  { %s2042_s13 = scalar_lea.vmem %s49_s28, 6144  ;;  %p2047_p6 = scmp.lt.s32.totalorder %s49_s28, %s49_s28 }
  0x2b   :  { %p2043_p5 = scmp.ne.s32.totalorder %s49_s28, %s2042_s13  ;;  %p2048_p7 = scmp.lt.s32.totalorder %s2042_s13, %s2042_s13 }
  0x2d   :  { %p2049_p8 = por %p2048_p7, %p2047_p6 }
  0x2f   :  { %p2050_p9 = pnand %p2049_p8, %p2043_p5 }
  0x31   :  { %2053 = shalt.err (!%p2050_p9)
}
  0x32   :  { %s2087_s3 = smov 64   ;;  %s2088_s27 = smov 4  }
  0x33   :  { %54 = dma.hbm_to_vmem [thread:$0]  %s2255_s5, 6144, %s49_s28, [#allocation5], %s2087_s3, %s2087_s3, %s2088_s27  }
  0x34   :  { %s2089_s16 = smov [#allocation7]   ;;  %s2054_s20 = scalar_lea.hbm %s2256_s6, 16 }
  0x35   :  { %s61_s17 = sshll.u32 %s2089_s16, 4  ;;  %p2055_p10 = scmp.ne.s32.totalorder %s2256_s6, %s2054_s20  ;;  %s62_s17 = int_to_ptr.vmem [resolvable:$true] %s61_s17 }
  0x36   :  { %p2058_p11 = scmp.lt.u32.totalorder %s2054_s20, %s2256_s6 }
  0x38   :  { %p2060_p12 = pnand %p2058_p11, %p2055_p10 }
  0x3a   :  { %2063 = shalt.err (!%p2060_p12)
}
  0x3b   :  { %s2064_s24 = scalar_lea.vmem %s62_s17, 16  ;;  %s2068_s5 = scalar_lea.vmem %s62_s17, 32 }
  0x3c   :  { %p2065_p13 = scmp.ne.s32.totalorder %s62_s17, %s2064_s24  ;;  %p2069_p0 = scmp.lt.s32.totalorder %s62_s17, %s62_s17 }
  0x3d   :  { %p2070_p1 = scmp.lt.s32.totalorder %s2068_s5, %s2064_s24 }
  0x3f   :  { %p2071_p2 = por %p2070_p1, %p2069_p0 }
  0x41   :  { %p2072_p3 = pnand %p2071_p2, %p2065_p13 }
  0x43   :  { %2075 = shalt.err (!%p2072_p3)
}
  0x44   :  { %64 = dma.hbm_to_vmem [thread:$0]  %s2256_s6, 16, %s62_s17, [#allocation8]  }
  0x45   :  { %2076 = dma.done.wait [#allocation3], 12288  }
  0x46   :  { %2077 = vsyncadd [#allocation3], 4294955008 }
  0x47   :  { %2078 = dma.done.wait [#allocation5], 6240  }
  0x48   :  { %2079 = vsyncadd [#allocation5], 4294961056 }
  0x49   :  { %2080 = dma.done.wait [#allocation8], 16  }
  0x4a   :  { %2081 = vsyncadd [#allocation8], 4294967280  ;;  %v2090_v0 = vmov 0   ;;  %v1787_v1 = vld [vmem:[%s2251_s1 + $0x4] ss:$24 sps:$4 sm:$0xff]   ;;  %vm147_vm0 = vcmask 130048  }
  0x4b   :  { %183 = vmatprep.mubr.bf16.mxu0 %v2090_v0  ;;  %v1789_v2 = vld [vmem:[%s2251_s1] ss:$24 sps:$4 sm:$0xff]   ;;  %151 = vmatprep.subr.bf16.mxu0 %v1787_v1  ;;  %v1792_v5 = vld [vmem:[%s2251_s1 + $0xc] ss:$24 sps:$4 sm:$0xff]   ;;  %v1799_v9 = vld [vmem:[#allocation2 + $0x14] ss:$8 sps:$4 sm:$0xff]  }
  0x4c   :  { %v78_v3 = vld [vmem:[%s2250_s0] sm:$0xf]  ;;  %152 = vmatpush1.bf16.msra.mxu0 %v1789_v2  ;;  %v1793_v6 = vld [vmem:[#allocation2 + $0x4] ss:$8 sps:$4 sm:$0xff]   ;;  %v1801_v10 = vld [vmem:[#allocation2 + $0x10] ss:$8 sps:$4 sm:$0xff]  }
  0x4d   :  { %v1790_v4 = vld [vmem:[%s2251_s1 + $0x8] ss:$24 sps:$4 sm:$0xff]   ;;  %192 = vmatprep.subr.bf16.mxu0 %v1792_v5  ;;  %490 = vmatprep.subr.bf16.mxu1 %v1793_v6  ;;  %v1797_v7 = vld [vmem:[%s2251_s1 + $0x14] ss:$24 sps:$4 sm:$0xff]   ;;  %v1813_v16 = vld [vmem:[#allocation2 + $0x30] ss:$8 sps:$4 sm:$0xff]  }
  0x4e   :  { %v1798_v8 = vld [vmem:[#allocation2] ss:$8 sps:$4 sm:$0xff]   ;;  %v1802_v11 = vld [vmem:[#allocation2 + $0x24] ss:$8 sps:$4 sm:$0xff]   ;;  %v1808_v15 = vld [vmem:[#allocation2 + $0x34] ss:$8 sps:$4 sm:$0xff]  }
  0x4f   :  { %1564 = vmatmul.mubr.msk.bf16.vlgmr.msra.gmra.mrb[0].mxu0 %vm147_vm0, %v78_v3  ;;  %491 = vmatpush1.bf16.msra.mxu1 %v1798_v8  ;;  %v1795_v12 = vld [vmem:[%s2251_s1 + $0x10] ss:$24 sps:$4 sm:$0xff]   ;;  %v1806_v13 = vld [vmem:[#allocation2 + $0x104] ss:$8 sps:$4 sm:$0xff]   ;;  %v1812_v19 = vld [vmem:[#allocation2 + $0x114] ss:$8 sps:$4 sm:$0xff]  }
  0x50   :  { %193 = vmatpush1.bf16.msra.mxu0 %v1790_v4  ;;  %224 = vmatprep.mubr.bf16.mxu0 %v2090_v0  ;;  %v1807_v14 = vld [vmem:[#allocation2 + $0x20] ss:$8 sps:$4 sm:$0xff]   ;;  %v1814_v17 = vld [vmem:[#allocation2 + $0x44] ss:$8 sps:$4 sm:$0xff]   ;;  %v1820_v21 = vld [vmem:[#allocation2 + $0x54] ss:$8 sps:$4 sm:$0xff]  }
  0x51   :  { %233 = vmatprep.subr.bf16.mxu0 %v1797_v7  ;;  %492 = vmatprep.subr.bf16.mxu1 %v1799_v9  ;;  %v1804_v18 = vld [vmem:[#allocation2 + $0x100] ss:$8 sps:$4 sm:$0xff]   ;;  %v1810_v22 = vld [vmem:[#allocation2 + $0x110] ss:$8 sps:$4 sm:$0xff]   ;;  %v1818_v23 = vld [vmem:[#allocation2 + $0x124] ss:$8 sps:$4 sm:$0xff]  }
  0x52   :  { %v1819_v20 = vld [vmem:[#allocation2 + $0x40] ss:$8 sps:$4 sm:$0xff]   ;;  %v1825_v24 = vld [vmem:[#allocation2 + $0x50] ss:$8 sps:$4 sm:$0xff]   ;;  %v1826_v25 = vld [vmem:[#allocation2 + $0x64] ss:$8 sps:$4 sm:$0xff]  }
  0x53   :  { %493 = vmatpush1.bf16.msra.mxu1 %v1801_v10  ;;  %v1816_v26 = vld [vmem:[#allocation2 + $0x120] ss:$8 sps:$4 sm:$0xff]   ;;  %v1824_v27 = vld [vmem:[#allocation2 + $0x134] ss:$8 sps:$4 sm:$0xff]   ;;  %v1822_v30 = vld [vmem:[#allocation2 + $0x130] ss:$8 sps:$4 sm:$0xff]   ;;  %v87_v10 = vlaneseq }
  0x54   :  { %494 = vmatprep.subr.bf16.mxu1 %v1802_v11  ;;  %v1831_v28 = vld [vmem:[#allocation2 + $0x60] ss:$8 sps:$4 sm:$0xff]   ;;  %v1832_v29 = vld [vmem:[#allocation2 + $0x74] ss:$8 sps:$4 sm:$0xff]   ;;  %v1830_v31 = vld [vmem:[#allocation2 + $0x144] ss:$8 sps:$4 sm:$0xff]  }
  0x55   :  { %v1837_v32 = vld [vmem:[#allocation2 + $0x70] ss:$8 sps:$4 sm:$0xff]   ;;  %v1838_v33 = vld [vmem:[#allocation2 + $0x84] ss:$8 sps:$4 sm:$0xff]   ;;  %v1828_v34 = vld [vmem:[#allocation2 + $0x140] ss:$8 sps:$4 sm:$0xff]  }
  0x56   :  { %v1836_v35 = vld [vmem:[#allocation2 + $0x154] ss:$8 sps:$4 sm:$0xff]   ;;  %v1843_v36 = vld [vmem:[#allocation2 + $0x80] ss:$8 sps:$4 sm:$0xff]   ;;  %v1834_v38 = vld [vmem:[#allocation2 + $0x150] ss:$8 sps:$4 sm:$0xff]  }
  0x57   :  { %1565 = vmatmul.mubr.msk.bf16.vlgmr.msra.gmra.mrb[4].mxu0 %vm147_vm0, %v78_v3  ;;  %495 = vmatpush1.bf16.msra.mxu1 %v1807_v14  ;;  %v1844_v37 = vld [vmem:[#allocation2 + $0x94] ss:$8 sps:$4 sm:$0xff]   ;;  %v1842_v39 = vld [vmem:[#allocation2 + $0x164] ss:$8 sps:$4 sm:$0xff]   ;;  %v1849_v40 = vld [vmem:[#allocation2 + $0x90] ss:$8 sps:$4 sm:$0xff]  }
  0x58   :  { %234 = vmatpush1.bf16.msra.mxu0 %v1795_v12  ;;  %265 = vmatprep.mubr.bf16.mxu0 %v2090_v0  ;;  %v1850_v41 = vld [vmem:[#allocation2 + $0xa4] ss:$8 sps:$4 sm:$0xff]   ;;  %v1840_v42 = vld [vmem:[#allocation2 + $0x160] ss:$8 sps:$4 sm:$0xff]   ;;  %v1848_v43 = vld [vmem:[#allocation2 + $0x174] ss:$8 sps:$4 sm:$0xff]  }
  0x59   :  { %772 = vmatprep.subr.bf16.mxu0 %v1806_v13  ;;  %496 = vmatprep.subr.bf16.mxu1 %v1808_v15  ;;  %v1855_v44 = vld [vmem:[#allocation2 + $0xa0] ss:$8 sps:$4 sm:$0xff]   ;;  %v1856_v45 = vld [vmem:[#allocation2 + $0xb4] ss:$8 sps:$4 sm:$0xff]   ;;  %v1846_v46 = vld [vmem:[#allocation2 + $0x170] ss:$8 sps:$4 sm:$0xff]  }
  0x5a   :  { %v1854_v47 = vld [vmem:[#allocation2 + $0x184] ss:$8 sps:$4 sm:$0xff]   ;;  %v1861_v48 = vld [vmem:[#allocation2 + $0xb0] ss:$8 sps:$4 sm:$0xff]   ;;  %v1852_v50 = vld [vmem:[#allocation2 + $0x180] ss:$8 sps:$4 sm:$0xff]  }
  0x5b   :  { %497 = vmatpush1.bf16.msra.mxu1 %v1813_v16  ;;  %v1862_v49 = vld [vmem:[#allocation2 + $0xc4] ss:$8 sps:$4 sm:$0xff]   ;;  %v1860_v51 = vld [vmem:[#allocation2 + $0x194] ss:$8 sps:$4 sm:$0xff]   ;;  %v1867_v52 = vld [vmem:[#allocation2 + $0xc0] ss:$8 sps:$4 sm:$0xff]  }
  0x5c   :  { %498 = vmatprep.subr.bf16.mxu1 %v1814_v17  ;;  %v1868_v53 = vld [vmem:[#allocation2 + $0xd4] ss:$8 sps:$4 sm:$0xff]   ;;  %v1858_v54 = vld [vmem:[#allocation2 + $0x190] ss:$8 sps:$4 sm:$0xff]   ;;  %v1866_v55 = vld [vmem:[#allocation2 + $0x1a4] ss:$8 sps:$4 sm:$0xff]  }
  0x5d   :  { %v1873_v56 = vld [vmem:[#allocation2 + $0xd0] ss:$8 sps:$4 sm:$0xff]   ;;  %v1864_v57 = vld [vmem:[#allocation2 + $0x1a0] ss:$8 sps:$4 sm:$0xff]   ;;  %v1872_v58 = vld [vmem:[#allocation2 + $0x1b4] ss:$8 sps:$4 sm:$0xff]  }
  0x5e   :  { %v1870_v59 = vld [vmem:[#allocation2 + $0x1b0] ss:$8 sps:$4 sm:$0xff]   ;;  %v1874_v60 = vld [vmem:[#allocation2 + $0xe4] ss:$8 sps:$4 sm:$0xff]   ;;  %v1876_v62 = vld [vmem:[#allocation2 + $0x1c0] ss:$8 sps:$4 sm:$0xff]  }
  0x5f   :  { %1566 = vmatmul.mubr.msk.bf16.vlgmr.msra.gmra.mrb[8].mxu0 %vm147_vm0, %v78_v3  ;;  %499 = vmatpush1.bf16.msra.mxu1 %v1819_v20  ;;  %v1878_v61 = vld [vmem:[#allocation2 + $0x1c4] ss:$8 sps:$4 sm:$0xff]   ;;  %v1879_v63 = vld [vmem:[#allocation2 + $0xe0] ss:$8 sps:$4 sm:$0xff]   ;;  %v1880_v0 = vld [vmem:[#allocation2 + $0xf4] ss:$8 sps:$4 sm:$0xff]  }
  0x60   :  { %773 = vmatpush1.bf16.msra.mxu0 %v1804_v18  ;;  %500 = vmatprep.subr.bf16.mxu1 %v1820_v21  ;;  %v1884_v1 = vld [vmem:[#allocation2 + $0x1d4] ss:$8 sps:$4 sm:$0xff]   ;;  %v1882_v2 = vld [vmem:[#allocation2 + $0x1d0] ss:$8 sps:$4 sm:$0xff]   ;;  %v1888_v4 = vld [vmem:[#allocation2 + $0x1e4] ss:$8 sps:$4 sm:$0xff]  }
  0x61   :  { %774 = vmatprep.subr.bf16.mxu0 %v1812_v19  ;;  %v1885_v3 = vld [vmem:[#allocation2 + $0xf0] ss:$8 sps:$4 sm:$0xff]   ;;  %v1886_v5 = vld [vmem:[#allocation2 + $0x1e0] ss:$8 sps:$4 sm:$0xff]   ;;  %v1891_v6 = vld [vmem:[#allocation2 + $0x1f4] ss:$8 sps:$4 sm:$0xff]  }
  0x62   :  { %v1889_v7 = vld [vmem:[#allocation2 + $0x1f0] ss:$8 sps:$4 sm:$0xff]   ;;  %v1892_v8 = vld [vmem:[#allocation6 + $0x40] sm:$0xff]   ;;  %v2210_v11 = vshrl.u32 %v87_v10, 7  ;;  %v2218_v13 = vld [vmem:[%s2252_s2] sm:$0x3f] }
  0x63   :  { %501 = vmatpush1.bf16.msra.mxu1 %v1825_v24  ;;  %v1896_v9 = vld [vmem:[#allocation6 + $0xc0] sm:$0xff]   ;;  %v1923_v10 = vld [vmem:[#allocation6 + $0xb8] sm:$0xff]  }
  0x64   :  { %775 = vmatpush1.bf16.msra.mxu0 %v1810_v22  ;;  %502 = vmatprep.subr.bf16.mxu1 %v1826_v25  ;;  %v2213_v12 = vsub.s32 0, %v2210_v11  ;;  %v2221_v14 = vsub.s32 1, %v2210_v11  ;;  %v97_v20 = vsub.s32 2, %v2210_v11 }
  0x65   :  { %776 = vmatprep.subr.bf16.mxu0 %v1818_v23  ;;  %v101_v23 = vsub.s32 3, %v2210_v11 }
  0x66   :  { %v90_v15 = vrot.slane %v2218_v13, %v2213_v12  ;;  %v94_v16 = vrot.slane %v2218_v13, %v2221_v14 }
  0x67   :  { %503 = vmatpush1.bf16.msra.mxu1 %v1831_v28 }
  0x68   :  { %777 = vmatpush1.bf16.msra.mxu0 %v1816_v26  ;;  %504 = vmatprep.subr.bf16.mxu1 %v1832_v29  ;;  %v102_v29 = vrot.slane %v2218_v13, %v101_v23 }
  0x69   :  { %778 = vmatprep.subr.bf16.mxu0 %v1824_v27  ;;  %v98_v27 = vrot.slane %v2218_v13, %v97_v20 }
  0x6b   :  { %505 = vmatpush1.bf16.msra.mxu1 %v1837_v32  ;;  %v1900_v32 = vld [vmem:[#allocation6 + $0xc8] sm:$0xff]  }
  0x6c   :  { %779 = vmatpush1.bf16.msra.mxu0 %v1822_v30  ;;  %506 = vmatprep.subr.bf16.mxu1 %v1838_v33  ;;  %v1897_v30 = vld [vmem:[#allocation6 + $0x80] sm:$0xff]  }
  0x6d   :  { %780 = vmatprep.subr.bf16.mxu0 %v1830_v31 }
  0x6f   :  { %507 = vmatpush1.bf16.msra.mxu1 %v1843_v36 }
  0x70   :  { %781 = vmatpush1.bf16.msra.mxu0 %v1828_v34  ;;  %508 = vmatprep.subr.bf16.mxu1 %v1844_v37 }
  0x71   :  { %782 = vmatprep.subr.bf16.mxu0 %v1836_v35 }
  0x73   :  { %509 = vmatpush1.bf16.msra.mxu1 %v1849_v40 }
  0x74   :  { %783 = vmatpush1.bf16.msra.mxu0 %v1834_v38  ;;  %510 = vmatprep.subr.bf16.mxu1 %v1850_v41  ;;  %v1901_v38 = vld [vmem:[#allocation6 + $0x88] sm:$0xff]   ;;  %v1904_v41 = vld [vmem:[#allocation6 + $0xd0] sm:$0xff]  }
  0x75   :  { %784 = vmatprep.subr.bf16.mxu0 %v1842_v39 }
  0x77   :  { %511 = vmatpush1.bf16.msra.mxu1 %v1855_v44  ;;  %v1893_v44 = vld [vmem:[#allocation6] sm:$0xff]  }
  0x78   :  { %785 = vmatpush1.bf16.msra.mxu0 %v1840_v42  ;;  %512 = vmatprep.subr.bf16.mxu1 %v1856_v45  ;;  %v1905_v45 = vld [vmem:[#allocation6 + $0x90] sm:$0xff]  }
  0x79   :  { %786 = vmatprep.subr.bf16.mxu0 %v1848_v43 }
  0x7b   :  { %513 = vmatpush1.bf16.msra.mxu1 %v1861_v48  ;;  %v1908_v48 = vld [vmem:[#allocation6 + $0xd8] sm:$0xff]  }
  0x7c   :  { %787 = vmatpush1.bf16.msra.mxu0 %v1846_v46  ;;  %514 = vmatprep.subr.bf16.mxu1 %v1862_v49 }
  0x7d   :  { %788 = vmatprep.subr.bf16.mxu0 %v1854_v47  ;;  %v1894_v47 = vld [vmem:[#allocation6 + $0x48] sm:$0xff]  }
  0x7f   :  { %515 = vmatpush1.bf16.msra.mxu1 %v1867_v52  ;;  %v1895_v52 = vld [vmem:[#allocation6 + $0x8] sm:$0xff]  }
  0x80   :  { %789 = vmatpush1.bf16.msra.mxu0 %v1852_v50  ;;  %516 = vmatprep.subr.bf16.mxu1 %v1868_v53  ;;  %v1909_v53 = vld [vmem:[#allocation6 + $0x98] sm:$0xff]  }
  0x81   :  { %790 = vmatprep.subr.bf16.mxu0 %v1860_v51 }
  0x83   :  { %517 = vmatpush1.bf16.msra.mxu1 %v1873_v56  ;;  %v1899_v56 = vld [vmem:[#allocation6 + $0x10] sm:$0xff]  }
  0x84   :  { %791 = vmatpush1.bf16.msra.mxu0 %v1858_v54  ;;  %518 = vmatprep.subr.bf16.mxu1 %v1874_v60  ;;  %v1907_v60 = vld [vmem:[#allocation6 + $0x20] sm:$0xff]  }
  0x85   :  { %792 = vmatprep.subr.bf16.mxu0 %v1866_v55  ;;  %v1898_v55 = vld [vmem:[#allocation6 + $0x50] sm:$0xff]  }
  0x87   :  { %519 = vmatpush1.bf16.msra.mxu1 %v1879_v63  ;;  %v1912_v63 = vld [vmem:[#allocation6 + $0xe0] sm:$0xff]  }
  0x88   :  { %793 = vmatpush1.bf16.msra.mxu0 %v1864_v57  ;;  %520 = vmatprep.subr.bf16.mxu1 %v1880_v0  ;;  %v1902_v57 = vld [vmem:[#allocation6 + $0x58] sm:$0xff]   ;;  %v1913_v0 = vld [vmem:[#allocation6 + $0xa0] sm:$0xff]  }
  0x89   :  { %794 = vmatprep.subr.bf16.mxu0 %v1872_v58  ;;  %v1903_v58 = vld [vmem:[#allocation6 + $0x18] sm:$0xff]  }
  0x8b   :  { %521 = vmatpush1.bf16.msra.mxu1 %v1885_v3  ;;  %v1916_v3 = vld [vmem:[#allocation6 + $0xe8] sm:$0xff]  }
  0x8c   :  { %795 = vmatpush1.bf16.msra.mxu0 %v1870_v59  ;;  %1712 = vmatprep.subr.bf16.mxu1 %v1896_v9  ;;  %v1906_v59 = vld [vmem:[#allocation6 + $0x60] sm:$0xff]   ;;  %v1922_v9 = vld [vmem:[#allocation6 + $0xf8] sm:$0xff]  }
  0x8d   :  { %796 = vmatprep.subr.bf16.mxu0 %v1878_v61  ;;  %v1910_v61 = vld [vmem:[#allocation6 + $0x68] sm:$0xff]  }
  0x90   :  { %797 = vmatpush1.bf16.msra.mxu0 %v1876_v62  ;;  %v1911_v62 = vld [vmem:[#allocation6 + $0x28] sm:$0xff]  }
  0x91   :  { %798 = vmatprep.subr.bf16.mxu0 %v1884_v1  ;;  %v1914_v1 = vld [vmem:[#allocation6 + $0x70] sm:$0xff]  }
  0x94   :  { %799 = vmatpush1.bf16.msra.mxu0 %v1882_v2  ;;  %v1915_v2 = vld [vmem:[#allocation6 + $0x30] sm:$0xff]  }
  0x95   :  { %800 = vmatprep.subr.bf16.mxu0 %v1888_v4  ;;  %v1917_v4 = vld [vmem:[#allocation6 + $0xa8] sm:$0xff]  }
  0x98   :  { %801 = vmatpush1.bf16.msra.mxu0 %v1886_v5  ;;  %v1918_v5 = vld [vmem:[#allocation6 + $0x78] sm:$0xff]  }
  0x99   :  { %802 = vmatprep.subr.bf16.mxu0 %v1891_v6  ;;  %v1919_v6 = vld [vmem:[#allocation6 + $0x38] sm:$0xff]  }
  0x9c   :  { %803 = vmatpush1.bf16.msra.mxu0 %v1889_v7  ;;  %v1920_v7 = vld [vmem:[#allocation6 + $0xf0] sm:$0xff]  }
  0x9d   :  { %1734 = vmatprep.subr.bf16.mxu0 %v1892_v8  ;;  %v1921_v8 = vld [vmem:[#allocation6 + $0xb0] sm:$0xff]  }
 0x122   :  { %v185_v17 = vpop.f32.mrb[0].mxu0 }
 0x123   :  { %v186_v18 = vadd.f32 %v185_v17, %v90_v15  ;;  %v187_v19 = vpop.f32.mrb[1].mxu0  ;;  %v1926_v15 = vld [vmem:[#allocation2 + $0x204] ss:$8 sps:$4 sm:$0xff]  }
 0x124   :  { %v188_v21 = vadd.f32 %v187_v19, %v94_v16  ;;  %v189_v22 = vpop.f32.mrb[2].mxu0  ;;  %v318_v16 = vld [vmem:[#allocation4] sm:$0x3]  ;;  %v109_v19 = vsub.s32 5, %v2210_v11 }
 0x125   :  { %v274_v24 = vmax.f32 %v186_v18, 0.0  ;;  %v190_v25 = vpop.f32.mrb[3].mxu0  ;;  %v323_v17 = vrot.slane %v318_v16, %v2213_v12  ;;  %v327_v18 = vrot.slane %v318_v16, %v2221_v14 }
 0x126   :  { %v275_v26 = vmax.f32 %v188_v21, 0.0  ;;  %v600_v25 = vld [vmem:[#allocation4 + $0x2] sm:$0x3] }
 0x127   :  { %v280_v31 = vpack.c.bf16 %v274_v24, %v274_v24 }
 0x128   :  { %v281_v28 = vpack.c.bf16 %v275_v26, %v275_v26 }
 0x12a   :  { %v226_v33 = vpop.f32.mrb[4].mxu0  ;;  %522 = vmatprep.mubr.bf16.mxu1 %v281_v28  ;;  %v110_v28 = vrot.slane %v2218_v13, %v109_v19 }
 0x12b   :  { %v227_v34 = vadd.f32 %v226_v33, %v98_v27  ;;  %v228_v35 = vpop.f32.mrb[5].mxu0  ;;  %523 = vmatmul.mubr.bf16.vlgmr.msra.gmra.mrb[0].mxu1 %v280_v31 }
 0x12c   :  { %v229_v36 = vadd.f32 %v228_v35, %v102_v29  ;;  %v230_v37 = vpop.f32.mrb[6].mxu0  ;;  %1713 = vmatpush3.bf16.msra.mxu1 %v1897_v30  ;;  %v605_v30 = vrot.slane %v600_v25, %v2213_v12 }
 0x12d   :  { %v276_v39 = vmax.f32 %v227_v34, 0.0  ;;  %v231_v40 = vpop.f32.mrb[7].mxu0  ;;  %1714 = vmatprep.subr.bf16.mxu1 %v1900_v32  ;;  %v609_v32 = vrot.slane %v600_v25, %v2221_v14  ;;  %v1974_v25 = vld [vmem:[#allocation6 + $0x148] sm:$0xff]  }
 0x12e   :  { %v277_v42 = vmax.f32 %v229_v36, 0.0 }
 0x12f   :  { %v282_v46 = vpack.c.bf16 %v276_v39, %v276_v39 }
 0x130   :  { %v283_v43 = vpack.c.bf16 %v277_v42, %v277_v42  ;;  %1715 = vmatpush3.bf16.msra.mxu1 %v1901_v38 }
 0x131   :  { %1716 = vmatprep.subr.bf16.mxu1 %v1904_v41 }
 0x132   :  { %804 = vmatprep.mubr.bf16.mxu0 %v283_v43  ;;  %v2231_v49 = vpop.f32.mrb[8].mxu0 }
 0x133   :  { %805 = vmatmul.mubr.bf16.vlgmr.msra.gmra.mrb[12].mxu0 %v282_v46  ;;  %v2233_v50 = vpop.f32.mrb[9].mxu0 }
 0x134   :  { %v271_v51 = vpop.f32.mrb[10].mxu0  ;;  %1735 = vmatpush3.bf16.msra.mxu0 %v1893_v44  ;;  %1717 = vmatpush3.bf16.msra.mxu1 %v1905_v45  ;;  %v270_v34 = vadd.f32 %v2233_v50, %v110_v28  ;;  %v1924_v45 = vld [vmem:[#allocation2 + $0x200] ss:$8 sps:$4 sm:$0xff]   ;;  %v1927_v50 = vld [vmem:[#allocation2 + $0x210] ss:$8 sps:$4 sm:$0xff]  }
 0x135   :  { %v272_v54 = vpop.f32.mrb[11].mxu0  ;;  %1736 = vmatprep.subr.bf16.mxu0 %v1894_v47  ;;  %1718 = vmatprep.subr.bf16.mxu1 %v1908_v48  ;;  %v1929_v47 = vld [vmem:[#allocation2 + $0x214] ss:$8 sps:$4 sm:$0xff]   ;;  %v1932_v51 = vld [vmem:[#allocation2 + $0x224] ss:$8 sps:$4 sm:$0xff]  }
 0x136   :  { %v279_v42 = vmax.f32 %v270_v34, 0.0  ;;  %v1933_v54 = vld [vmem:[#allocation2 + $0x230] ss:$8 sps:$4 sm:$0xff]   ;;  %v1979_v28 = vld [vmem:[#allocation6 + $0x118] sm:$0xff]  }
 0x137   :  { %v1985_v34 = vld [vmem:[#allocation6 + $0x130] sm:$0xff]  }
 0x138   :  { %1737 = vmatpush3.bf16.msra.mxu0 %v1895_v52  ;;  %1719 = vmatpush3.bf16.msra.mxu1 %v1909_v53  ;;  %v285_v48 = vpack.c.bf16 %v279_v42, %v279_v42  ;;  %v1930_v52 = vld [vmem:[#allocation2 + $0x220] ss:$8 sps:$4 sm:$0xff]   ;;  %v1935_v53 = vld [vmem:[#allocation2 + $0x234] ss:$8 sps:$4 sm:$0xff]  }
 0x139   :  { %1738 = vmatprep.subr.bf16.mxu0 %v1898_v55  ;;  %1720 = vmatprep.subr.bf16.mxu1 %v1912_v63  ;;  %v1938_v55 = vld [vmem:[#allocation2 + $0x244] ss:$8 sps:$4 sm:$0xff]  }
 0x13a   :  { %v1950_v63 = vld [vmem:[#allocation2 + $0x284] ss:$8 sps:$4 sm:$0xff]  }
 0x13c   :  { %1739 = vmatpush3.bf16.msra.mxu0 %v1899_v56  ;;  %1721 = vmatpush3.bf16.msra.mxu1 %v1913_v0  ;;  %v1936_v56 = vld [vmem:[#allocation2 + $0x240] ss:$8 sps:$4 sm:$0xff]  }
 0x13d   :  { %1740 = vmatprep.subr.bf16.mxu0 %v1902_v57  ;;  %1722 = vmatprep.subr.bf16.mxu1 %v1916_v3  ;;  %v1941_v57 = vld [vmem:[#allocation2 + $0x254] ss:$8 sps:$4 sm:$0xff]   ;;  %v1948_v0 = vld [vmem:[#allocation2 + $0x280] ss:$8 sps:$4 sm:$0xff]   ;;  %v1956_v3 = vld [vmem:[#allocation2 + $0x2a4] ss:$8 sps:$4 sm:$0xff]  }
 0x140   :  { %1741 = vmatpush3.bf16.msra.mxu0 %v1903_v58  ;;  %1723 = vmatpush3.bf16.msra.mxu1 %v1917_v4  ;;  %v1939_v58 = vld [vmem:[#allocation2 + $0x250] ss:$8 sps:$4 sm:$0xff]   ;;  %v1954_v4 = vld [vmem:[#allocation2 + $0x2a0] ss:$8 sps:$4 sm:$0xff]  }
 0x141   :  { %1742 = vmatprep.subr.bf16.mxu0 %v1906_v59  ;;  %1724 = vmatprep.subr.bf16.mxu1 %v1920_v7  ;;  %v1944_v59 = vld [vmem:[#allocation2 + $0x264] ss:$8 sps:$4 sm:$0xff]  }
 0x142   :  { %v1962_v7 = vld [vmem:[#allocation2 + $0x2c4] ss:$8 sps:$4 sm:$0xff]  }
 0x144   :  { %1743 = vmatpush3.bf16.msra.mxu0 %v1907_v60  ;;  %1725 = vmatpush3.bf16.msra.mxu1 %v1921_v8  ;;  %v1942_v60 = vld [vmem:[#allocation2 + $0x260] ss:$8 sps:$4 sm:$0xff]  }
 0x145   :  { %1744 = vmatprep.subr.bf16.mxu0 %v1910_v61  ;;  %1726 = vmatprep.subr.bf16.mxu1 %v1922_v9  ;;  %v1947_v61 = vld [vmem:[#allocation2 + $0x274] ss:$8 sps:$4 sm:$0xff]   ;;  %v1960_v8 = vld [vmem:[#allocation2 + $0x2c0] ss:$8 sps:$4 sm:$0xff]   ;;  %v105_v9 = vsub.s32 4, %v2210_v11 }
 0x147   :  { %v106_v16 = vrot.slane %v2218_v13, %v105_v9  ;;  %v1975_v13 = vld [vmem:[#allocation6 + $0x108] sm:$0xff]  }
 0x148   :  { %1745 = vmatpush3.bf16.msra.mxu0 %v1911_v62  ;;  %1727 = vmatpush3.bf16.msra.mxu1 %v1923_v10  ;;  %v1945_v62 = vld [vmem:[#allocation2 + $0x270] ss:$8 sps:$4 sm:$0xff]   ;;  %v1965_v10 = vld [vmem:[#allocation2 + $0x2d4] ss:$8 sps:$4 sm:$0xff]  }
 0x149   :  { %1746 = vmatprep.subr.bf16.mxu0 %v1914_v1  ;;  %1327 = vmatprep.subr.bf16.mxu1 %v1926_v15  ;;  %v1953_v1 = vld [vmem:[#allocation2 + $0x294] ss:$8 sps:$4 sm:$0xff]   ;;  %v1963_v15 = vld [vmem:[#allocation2 + $0x2d0] ss:$8 sps:$4 sm:$0xff]   ;;  %v268_v19 = vadd.f32 %v2231_v49, %v106_v16 }
 0x14a   :  { %v1978_v49 = vld [vmem:[#allocation6 + $0x158] sm:$0xff]  }
 0x14c   :  { %1747 = vmatpush3.bf16.msra.mxu0 %v1915_v2  ;;  %v1951_v2 = vld [vmem:[#allocation2 + $0x290] ss:$8 sps:$4 sm:$0xff]  }
 0x14d   :  { %1748 = vmatprep.subr.bf16.mxu0 %v1918_v5  ;;  %v1959_v5 = vld [vmem:[#allocation2 + $0x2b4] ss:$8 sps:$4 sm:$0xff]  }
 0x150   :  { %1749 = vmatpush3.bf16.msra.mxu0 %v1919_v6  ;;  %v1957_v6 = vld [vmem:[#allocation2 + $0x2b0] ss:$8 sps:$4 sm:$0xff]  }
 0x1fe   :  { %v524_v20 = vpop.f32.mrb[0].mxu1 }
 0x1ff   :  { %v525_v21 = vadd.f32 %v524_v20, %v323_v17  ;;  %v526_v22 = vpop.f32.mrb[1].mxu1  ;;  %v1968_v17 = vld [vmem:[#allocation2 + $0x2e4] ss:$8 sps:$4 sm:$0xff]   ;;  %v1971_v20 = vld [vmem:[#allocation2 + $0x2f4] ss:$8 sps:$4 sm:$0xff]  }
 0x200   :  { %v527_v23 = vadd.f32 %v526_v22, %v327_v18  ;;  %v528_v24 = vpop.f32.mrb[2].mxu1  ;;  %v1966_v18 = vld [vmem:[#allocation2 + $0x2e0] ss:$8 sps:$4 sm:$0xff]   ;;  %v278_v22 = vmax.f32 %v268_v19, 0.0 }
 0x201   :  { %v531_v26 = vmax.f32 %v525_v21, 0.0  ;;  %v529_v27 = vpop.f32.mrb[3].mxu1  ;;  %v1969_v21 = vld [vmem:[#allocation2 + $0x2f0] ss:$8 sps:$4 sm:$0xff]   ;;  %v1973_v24 = vld [vmem:[#allocation6 + $0x100] sm:$0xff]  }
 0x202   :  { %v532_v29 = vmax.f32 %v527_v23, 0.0  ;;  %v284_v11 = vpack.c.bf16 %v278_v22, %v278_v22  ;;  %v1972_v23 = vld [vmem:[#allocation6 + $0x140] sm:$0xff]   ;;  %v1977_v27 = vld [vmem:[#allocation6 + $0x110] sm:$0xff]  }
 0x203   :  { %v533_v33 = vpack.c.bf16 %v531_v26, %v531_v26  ;;  %1756 = vmatprep.subr.bf16.mxu0 %v1972_v23  ;;  %v1976_v26 = vld [vmem:[#allocation6 + $0x150] sm:$0xff]  }
 0x204   :  { %v534_v31 = vpack.c.bf16 %v532_v29, %v532_v29  ;;  %v1980_v29 = vld [vmem:[#allocation6 + $0x160] sm:$0xff]  }
 0x206   :  { %v806_v35 = vpop.f32.mrb[12].mxu0  ;;  %1114 = vmatprep.mubr.bf16.mxu0 %v534_v31  ;;  %v1982_v31 = vld [vmem:[#allocation6 + $0x168] sm:$0xff]  }
 0x207   :  { %v807_v36 = vadd.f32 %v806_v35, %v605_v30  ;;  %v808_v37 = vpop.f32.mrb[13].mxu0  ;;  %1115 = vmatmul.mubr.bf16.vlgmr.msra.gmra.mrb[16].mxu0 %v533_v33  ;;  %v1981_v30 = vld [vmem:[#allocation6 + $0x120] sm:$0xff]   ;;  %v1984_v33 = vld [vmem:[#allocation6 + $0x170] sm:$0xff]   ;;  %v1986_v35 = vld [vmem:[#allocation6 + $0x178] sm:$0xff]  }
 0x208   :  { %v809_v38 = vadd.f32 %v808_v37, %v609_v32  ;;  %v810_v39 = vpop.f32.mrb[14].mxu0  ;;  %1757 = vmatpush3.bf16.msra.mxu0 %v1973_v24  ;;  %v1983_v32 = vld [vmem:[#allocation6 + $0x128] sm:$0xff]  }
 0x209   :  { %v813_v40 = vmax.f32 %v807_v36, 0.0  ;;  %v811_v41 = vpop.f32.mrb[15].mxu0  ;;  %1758 = vmatprep.subr.bf16.mxu0 %v1974_v25  ;;  %v1987_v36 = vld [vmem:[#allocation6 + $0x138] sm:$0xff]  }
 0x20a   :  { %v814_v43 = vmax.f32 %v809_v38, 0.0 }
 0x20b   :  { %v815_v46 = vpack.c.bf16 %v813_v40, %v813_v40 }
 0x20c   :  { %v816_v44 = vpack.c.bf16 %v814_v43, %v814_v43  ;;  %1759 = vmatpush3.bf16.msra.mxu0 %v1975_v13 }
 0x20d   :  { %1760 = vmatprep.subr.bf16.mxu0 %v1976_v26 }
 0x20e   :  { %978 = vmatprep.mubr.bf16.mxu1 %v816_v44 }
 0x20f   :  { %979 = vmatmul.mubr.bf16.vlgmr.msra.gmra.mrb[4].mxu1 %v815_v46 }
 0x210   :  { %1328 = vmatpush1.bf16.msra.mxu1 %v1924_v45  ;;  %1359 = vmatprep.mubr.bf16.mxu1 %v285_v48  ;;  %v1155_v48 = vld [vmem:[#allocation4 + $0x4] sm:$0x3] }
 0x211   :  { %1329 = vmatprep.subr.bf16.mxu1 %v1929_v47  ;;  %1761 = vmatpush3.bf16.msra.mxu0 %v1977_v27 }
 0x212   :  { %1762 = vmatprep.subr.bf16.mxu0 %v1978_v49 }
 0x214   :  { %1330 = vmatpush1.bf16.msra.mxu1 %v1927_v50  ;;  %v1160_v50 = vrot.slane %v1155_v48, %v2213_v12 }
 0x215   :  { %1331 = vmatprep.subr.bf16.mxu1 %v1932_v51  ;;  %1763 = vmatpush3.bf16.msra.mxu0 %v1979_v28  ;;  %v1164_v51 = vrot.slane %v1155_v48, %v2221_v14 }
 0x216   :  { %1764 = vmatprep.subr.bf16.mxu0 %v1980_v29 }
 0x218   :  { %1332 = vmatpush1.bf16.msra.mxu1 %v1930_v52 }
 0x219   :  { %1333 = vmatprep.subr.bf16.mxu1 %v1935_v53  ;;  %1765 = vmatpush3.bf16.msra.mxu0 %v1981_v30 }
 0x21a   :  { %1766 = vmatprep.subr.bf16.mxu0 %v1982_v31 }
 0x21c   :  { %1334 = vmatpush1.bf16.msra.mxu1 %v1933_v54 }
 0x21d   :  { %1335 = vmatprep.subr.bf16.mxu1 %v1938_v55  ;;  %1767 = vmatpush3.bf16.msra.mxu0 %v1983_v32 }
 0x21e   :  { %1768 = vmatprep.subr.bf16.mxu0 %v1984_v33 }
 0x220   :  { %1336 = vmatpush1.bf16.msra.mxu1 %v1936_v56 }
 0x221   :  { %1337 = vmatprep.subr.bf16.mxu1 %v1941_v57  ;;  %1769 = vmatpush3.bf16.msra.mxu0 %v1985_v34 }
 0x222   :  { %1770 = vmatprep.subr.bf16.mxu0 %v1986_v35 }
 0x224   :  { %1338 = vmatpush1.bf16.msra.mxu1 %v1939_v58 }
 0x225   :  { %1339 = vmatprep.subr.bf16.mxu1 %v1944_v59  ;;  %1771 = vmatpush3.bf16.msra.mxu0 %v1987_v36 }
 0x228   :  { %1340 = vmatpush1.bf16.msra.mxu1 %v1942_v60 }
 0x229   :  { %1341 = vmatprep.subr.bf16.mxu1 %v1947_v61 }
 0x22c   :  { %1342 = vmatpush1.bf16.msra.mxu1 %v1945_v62 }
 0x22d   :  { %1343 = vmatprep.subr.bf16.mxu1 %v1950_v63 }
 0x230   :  { %1344 = vmatpush1.bf16.msra.mxu1 %v1948_v0 }
 0x231   :  { %1345 = vmatprep.subr.bf16.mxu1 %v1953_v1 }
 0x234   :  { %1346 = vmatpush1.bf16.msra.mxu1 %v1951_v2  ;;  %v1711_v2 = vld [vmem:[#allocation7] ss:$0 sm:$0xff] }
 0x235   :  { %1347 = vmatprep.subr.bf16.mxu1 %v1956_v3 }
 0x238   :  { %1348 = vmatpush1.bf16.msra.mxu1 %v1954_v4 }
 0x239   :  { %1349 = vmatprep.subr.bf16.mxu1 %v1959_v5 }
 0x23c   :  { %1350 = vmatpush1.bf16.msra.mxu1 %v1957_v6 }
 0x23d   :  { %1351 = vmatprep.subr.bf16.mxu1 %v1962_v7 }
 0x240   :  { %1352 = vmatpush1.bf16.msra.mxu1 %v1960_v8 }
 0x241   :  { %1353 = vmatprep.subr.bf16.mxu1 %v1965_v10 }
 0x244   :  { %1354 = vmatpush1.bf16.msra.mxu1 %v1963_v15 }
 0x245   :  { %1355 = vmatprep.subr.bf16.mxu1 %v1968_v17 }
 0x248   :  { %1356 = vmatpush1.bf16.msra.mxu1 %v1966_v18 }
 0x249   :  { %1357 = vmatprep.subr.bf16.mxu1 %v1971_v20 }
 0x24c   :  { %1358 = vmatpush1.bf16.msra.mxu1 %v1969_v21 }
 0x24f   :  { %1360 = vmatmul.mubr.bf16.vlgmr.msra.gmra.mrb[8].mxu1 %v284_v11 }
 0x2da   :  { %v1750_v37 = vpop.f32.mrb[16].mxu0 }
 0x2db   :  { %v1751_v38 = vpop.f32.mrb[17].mxu0 }
 0x2dc   :  { %v1752_v39 = vadd.f32 %v1751_v38, %v1750_v37  ;;  %v1753_v40 = vpop.f32.mrb[18].mxu0 }
 0x2dd   :  { %v1754_v41 = vpop.f32.mrb[19].mxu0 }
 0x2e2   :  { %v1728_v42 = vpop.f32.mrb[4].mxu1 }
 0x2e3   :  { %v1729_v43 = vpop.f32.mrb[5].mxu1 }
 0x2e4   :  { %v1730_v44 = vadd.f32 %v1729_v43, %v1728_v42  ;;  %v1731_v45 = vpop.f32.mrb[6].mxu1 }
 0x2e5   :  { %v1732_v46 = vpop.f32.mrb[7].mxu1 }
 0x2e6   :  { %v1117_v47 = vadd.f32 %v1752_v39, %v1730_v44 }
 0x322   :  { %v1361_v52 = vpop.f32.mrb[8].mxu1 }
 0x323   :  { %v1362_v53 = vadd.f32 %v1361_v52, %v1160_v50  ;;  %v1363_v54 = vpop.f32.mrb[9].mxu1 }
 0x324   :  { %v1364_v55 = vadd.f32 %v1363_v54, %v1164_v51  ;;  %v1365_v56 = vpop.f32.mrb[10].mxu1 }
 0x325   :  { %v1368_v57 = vmax.f32 %v1362_v53, 0.0  ;;  %v1366_v58 = vpop.f32.mrb[11].mxu1 }
 0x326   :  { %v1369_v59 = vmax.f32 %v1364_v55, 0.0 }
 0x327   :  { %v1370_v61 = vpack.c.bf16 %v1368_v57, %v1368_v57 }
 0x328   :  { %v1371_v60 = vpack.c.bf16 %v1369_v59, %v1369_v59 }
 0x32a   :  { %1533 = vmatprep.mubr.bf16.mxu0 %v1371_v60 }
 0x32b   :  { %1534 = vmatmul.mubr.bf16.vlgmr.msra.gmra.mrb[20].mxu0 %v1370_v61 }
 0x3fe   :  { %v1772_v62 = vpop.f32.mrb[20].mxu0 }
 0x3ff   :  { %v1773_v63 = vpop.f32.mrb[21].mxu0 }
 0x400   :  { %v1774_v0 = vadd.f32 %v1773_v63, %v1772_v62  ;;  %v1775_v1 = vpop.f32.mrb[22].mxu0 }
 0x401   :  { %v1776_v12 = vpop.f32.mrb[23].mxu0 }
 0x402   :  { %v1541_v3 = vadd.f32 %v1774_v0, %v1117_v47 }
 0x404   :  { %v1549_v14 = vadd.f32 %v1711_v2, %v1541_v3 }
 0x406   :  { %1550 = vst [vmem:[%s2257_s7] sm:$0xff] %v1549_v14 }
 0x407   :  { %1555 = vsyncpa [#allocation3], 1 }
 0x408   :  { %1556 = vsyncpa [#allocation5], 1 }
 0x409   :  { %1557 = vsyncpa [#allocation8], 1 }

</bundles_post_ra>
